<compile_context>
chip_gen: v6e
topology: v6e:2x2x1
jax: 0.10.0
libtpu: 0.0.40
codegen_flags: <defaults>
</compile_context>

<pallas_src>
import jax
import jax.numpy as jnp
from jax.experimental import pallas as pl
from jax.experimental.pallas import tpu as pltpu

INPUT_DIM = 2
HIDDEN_DIM = 10
OUTPUT_DIM = 1

LANE = 128      # vreg lane width
SUBLANE = 8     # f32 sublane count
HPAD = 16       # hidden dim padded to a multiple of 8 sublanes


def _mlp_kernel(x_ref, p_ref, o_ref):
    # x_ref: (8, B_blk)   rows 0..1 hold the two input features, batch on lanes.
    # p_ref: (16, 128)    packed params:
    #                       col 0 = w1[:, 0], col 1 = w1[:, 1], col 2 = b1,
    #                       col 3 = w2,       (0, 4) = b2; rows >= 10 are zero.
    # o_ref: (1, B_blk)   sigmoid output, batch on lanes (lane-dense store).
    x = x_ref[...]
    p = p_ref[...]

    x0 = x[0:1, :]                  # (1, B_blk)
    x1 = x[1:2, :]                  # (1, B_blk)
    w1c0 = p[:, 0:1]                # (16, 1)
    w1c1 = p[:, 1:2]                # (16, 1)
    b1 = p[:, 2:3]                  # (16, 1)
    w2c = p[:, 3:4]                 # (16, 1)
    b2 = p[0:1, 4:5]                # (1, 1)

    # Layer 1 on the VPU: two broadcast multiply-adds (no MXU pass for K=2).
    h = w1c0 * x0 + w1c1 * x1 + b1          # (16, B_blk)
    h = jnp.maximum(h, 0.0)                 # ReLU
    # Padded rows (>= HIDDEN_DIM) are exactly 0 and w2c is 0 there, so they
    # contribute nothing to the reduction below.

    # Layer 2: elementwise multiply + sublane (XLU) reduce -> (1, B_blk).
    z = jnp.sum(w2c * h, axis=0, keepdims=True) + b2

    # Sigmoid: exp + reciprocal land on the otherwise-idle EUP slot.
    o_ref[...] = jax.nn.sigmoid(z).astype(o_ref.dtype)


def pack_params(w1, b1, w2, b2):
    """Pack torch-layout params into a single (16, 128) f32 VMEM tile.

    w1: (10, 2)  torch layer_1.weight   b1: (10,)  layer_1.bias
    w2: (1, 10)  torch layer_2.weight   b2: (1,)   layer_2.bias
    """
    p = jnp.zeros((HPAD, LANE), jnp.float32)
    p = p.at[:HIDDEN_DIM, 0].set(w1[:, 0].astype(jnp.float32))
    p = p.at[:HIDDEN_DIM, 1].set(w1[:, 1].astype(jnp.float32))
    p = p.at[:HIDDEN_DIM, 2].set(b1.astype(jnp.float32))
    p = p.at[:HIDDEN_DIM, 3].set(w2[0, :].astype(jnp.float32))
    p = p.at[0, 4].set(b2[0].astype(jnp.float32))
    return p


def simple_nn_forward(x, params, *, block_b=512):
    """Forward pass of the 2-layer MLP inside one Pallas kernel.

    Args:
      x:      (B, 2) float32 input points.
      params: (16, 128) float32 packed parameter tile (see pack_params).
      block_b: lane-axis (batch) tile size; must be a multiple of 128.
    Returns:
      (B, 1) float32 sigmoid probabilities.
    """
    B = x.shape[0]
    b_ceil = ((B + LANE - 1) // LANE) * LANE      # pad batch to lane multiple
    block_b = min(block_b, b_ceil)                # stays a multiple of 128
    n_blocks = (b_ceil + block_b - 1) // block_b
    b_pad = n_blocks * block_b

    # Transposed, lane-padded input: features on sublanes, batch on lanes.
    x_t = jnp.zeros((SUBLANE, b_pad), jnp.float32)
    x_t = x_t.at[:INPUT_DIM, :B].set(x.T.astype(jnp.float32))

    out = pl.pallas_call(
        _mlp_kernel,
        out_shape=jax.ShapeDtypeStruct((1, b_pad), jnp.float32),
        grid=(n_blocks,),
        in_specs=[
            pl.BlockSpec((SUBLANE, block_b), lambda i: (0, i)),   # x tile
            pl.BlockSpec((HPAD, LANE), lambda i: (0, 0)),         # params resident
        ],
        out_specs=pl.BlockSpec((1, block_b), lambda i: (0, i)),
        compiler_params=pltpu.CompilerParams(
            dimension_semantics=("parallel",)),
    )(x_t, params)

    # Drop lane padding and restore the module's (B, 1) output layout.
    return out[0, :B][:, None]


def init_params(key):
    """Deterministic init mirroring the PyTorch module (torch layouts).

    layer_1.weight: kaiming_uniform_(nonlinearity='relu') over fan_in=2.
    layer_1.bias / layer_2.{weight,bias}: default torch Linear init.
    """
    k1, k2, k3, k4 = jax.random.split(key, 4)
    bound1_w = jnp.sqrt(6.0 / INPUT_DIM)
    bound1_b = 1.0 / jnp.sqrt(float(INPUT_DIM))
    bound2 = 1.0 / jnp.sqrt(float(HIDDEN_DIM))
    w1 = jax.random.uniform(k1, (HIDDEN_DIM, INPUT_DIM), jnp.float32,
                            minval=-bound1_w, maxval=bound1_w)
    b1 = jax.random.uniform(k2, (HIDDEN_DIM,), jnp.float32,
                            minval=-bound1_b, maxval=bound1_b)
    w2 = jax.random.uniform(k3, (OUTPUT_DIM, HIDDEN_DIM), jnp.float32,
                            minval=-bound2, maxval=bound2)
    b2 = jax.random.uniform(k4, (OUTPUT_DIM,), jnp.float32,
                            minval=-bound2, maxval=bound2)
    return w1, b1, w2, b2


if __name__ == "__main__":
    # TODO(synk): load_data/train/eval (make_circles, DataLoader, optimizer
    # loop) are host-side training utilities with no kernel equivalent; only
    # forward() is implemented here.
    key = jax.random.PRNGKey(0)
    k_params, k_x = jax.random.split(key)
    w1, b1, w2, b2 = init_params(k_params)
    params = pack_params(w1, b1, w2, b2)

    # Batch of 64 2-D points (matches the module's DataLoader batch_size=64).
    x = jax.random.normal(k_x, (64, INPUT_DIM), jnp.float32)

    out = simple_nn_forward(x, params)
    out = jax.block_until_ready(out)

    # Pure-JAX reference of the same forward semantics (torch layouts).
    ref = jax.nn.sigmoid(
        jnp.maximum(x @ w1.T + b1[None, :], 0.0) @ w2.T + b2[None, :]
    )
    assert out.shape == (64, OUTPUT_DIM), out.shape
    assert jnp.allclose(out, ref, atol=1e-5, rtol=1e-5)

    print("KERNEL_OK")
</pallas_src>

<mosaic_0001>
module attributes {stable_mosaic.version = 11 : i64} {
  func.func @_mlp_kernel(%arg0: i32, %arg1: memref<8x128xf32, #tpu.memory_space<vmem>>, %arg2: memref<16x128xf32, #tpu.memory_space<vmem>>, %arg3: memref<1x128xf32, #tpu.memory_space<vmem>>) attributes {dimension_semantics = [#tpu.dimension_semantics<parallel>], iteration_bounds = array<i64: 1>, scalar_prefetch = 0 : i64, scratch_operands = 0 : i64, tpu.core_type = #tpu.core_type<tc>, window_params = [{transform_indices = @transform_0, window_bounds = array<i64: 8, 128>}, {pipeline_mode = #tpu.pipeline_mode<synchronous>, transform_indices = @transform_1, window_bounds = array<i64: 16, 128>}, {transform_indices = @transform_2, window_bounds = array<i64: 1, 128>}]} {
    %c0 = arith.constant 0 : index
    %c0_0 = arith.constant 0 : index
    %0 = vector.load %arg1[%c0, %c0_0] : memref<8x128xf32, #tpu.memory_space<vmem>>, vector<8x128xf32>
    %c0_1 = arith.constant 0 : index
    %c0_2 = arith.constant 0 : index
    %1 = vector.load %arg2[%c0_1, %c0_2] : memref<16x128xf32, #tpu.memory_space<vmem>>, vector<16x128xf32>
    %2 = vector.extract_strided_slice %0 {offsets = [0, 0], sizes = [1, 128], strides = [1, 1]} : vector<8x128xf32> to vector<1x128xf32>
    %3 = vector.extract_strided_slice %0 {offsets = [1, 0], sizes = [1, 128], strides = [1, 1]} : vector<8x128xf32> to vector<1x128xf32>
    %4 = vector.extract_strided_slice %1 {offsets = [0, 0], sizes = [16, 1], strides = [1, 1]} : vector<16x128xf32> to vector<16x1xf32>
    %5 = vector.extract_strided_slice %1 {offsets = [0, 1], sizes = [16, 1], strides = [1, 1]} : vector<16x128xf32> to vector<16x1xf32>
    %6 = vector.extract_strided_slice %1 {offsets = [0, 2], sizes = [16, 1], strides = [1, 1]} : vector<16x128xf32> to vector<16x1xf32>
    %7 = vector.extract_strided_slice %1 {offsets = [0, 3], sizes = [16, 1], strides = [1, 1]} : vector<16x128xf32> to vector<16x1xf32>
    %8 = vector.extract_strided_slice %1 {offsets = [0, 4], sizes = [1, 1], strides = [1, 1]} : vector<16x128xf32> to vector<1x1xf32>
    %9 = vector.broadcast %4 : vector<16x1xf32> to vector<16x128xf32>
    %10 = vector.broadcast %2 : vector<1x128xf32> to vector<16x128xf32>
    %11 = arith.mulf %9, %10 : vector<16x128xf32>
    %12 = vector.broadcast %5 : vector<16x1xf32> to vector<16x128xf32>
    %13 = vector.broadcast %3 : vector<1x128xf32> to vector<16x128xf32>
    %14 = arith.mulf %12, %13 : vector<16x128xf32>
    %15 = arith.addf %11, %14 : vector<16x128xf32>
    %16 = vector.broadcast %6 : vector<16x1xf32> to vector<16x128xf32>
    %17 = arith.addf %15, %16 : vector<16x128xf32>
    %cst = arith.constant 0.000000e+00 : f32
    %18 = vector.broadcast %cst : f32 to vector<16x128xf32>
    %19 = arith.maximumf %17, %18 : vector<16x128xf32>
    %20 = vector.broadcast %7 : vector<16x1xf32> to vector<16x128xf32>
    %21 = arith.mulf %20, %19 : vector<16x128xf32>
    %cst_3 = arith.constant dense<0.000000e+00> : vector<128xf32>
    %22 = vector.multi_reduction <add>, %21, %cst_3 [0] : vector<16x128xf32> to vector<128xf32>
    %23 = vector.shape_cast %22 : vector<128xf32> to vector<1x128xf32>
    %24 = vector.broadcast %8 : vector<1x1xf32> to vector<1x128xf32>
    %25 = arith.addf %23, %24 : vector<1x128xf32>
    %26 = arith.negf %25 : vector<1x128xf32>
    %27 = math.exp %26 : vector<1x128xf32>
    %cst_4 = arith.constant 1.000000e+00 : f32
    %28 = vector.broadcast %cst_4 : f32 to vector<1x128xf32>
    %29 = arith.addf %28, %27 : vector<1x128xf32>
    %30 = arith.divf %28, %29 : vector<1x128xf32>
    %c0_5 = arith.constant 0 : index
    %c0_6 = arith.constant 0 : index
    %31 = vector.load %arg3[%c0_5, %c0_6] : memref<1x128xf32, #tpu.memory_space<vmem>>, vector<1x128xf32>
    tpu.vector_store %arg3[%c0_5, %c0_6], %30 {strides = array<i32>} : memref<1x128xf32, #tpu.memory_space<vmem>>, vector<1x128xf32>,
    return
  }
  func.func @transform_0(%arg0: i32) -> (i32, i32) {
    %c0_i32 = arith.constant 0 : i32
    %c0_i32_0 = arith.constant 0 : i32
    return %c0_i32, %arg0 : i32, i32
  }
  func.func @transform_1(%arg0: i32) -> (i32, i32) {
    %c0_i32 = arith.constant 0 : i32
    %c0_i32_0 = arith.constant 0 : i32
    %c0_i32_1 = arith.constant 0 : i32
    return %c0_i32, %c0_i32_0 : i32, i32
  }
  func.func @transform_2(%arg0: i32) -> (i32, i32) {
    %c0_i32 = arith.constant 0 : i32
    %c0_i32_0 = arith.constant 0 : i32
    return %c0_i32, %arg0 : i32, i32
  }
}

</mosaic_0001>

<bundles_post_ra>
// kernel: tpu_custom_call.1
= control target key start
LH: loop header
LB: loop body
LE: loop exit
PB: predicated region body
PF: predicated region fallthrough
CT: control target
= control target key end

     0   :  { %7 = vsyncpa [#allocation3], 0  ;;  %s253_s0 = inlined_call_operand.hbm [shape: f32[8,128], index: 0, kind: input, shape index: {}]   ;;  %s254_s1 = inlined_call_operand.hbm [shape: f32[16,128], index: 1, kind: input, shape index: {}]   ;;  %s255_s2 = inlined_call_operand.hbm [shape: f32[1,128], index: 2, kind: output, shape index: {}]  }
   0x1   :  { %8 = vsyncpa [#allocation6], 0 }
   0x2   :  { %9 = vsyncpa [#allocation4], 0  ;;  %s219_s9 = smov [#allocation2]   ;;  %s220_s11 = smov [#allocation5]  }
   0x3   :  { %s16_s10 = sshll.u32 %s219_s9, 4  ;;  %s25_s12 = sshll.u32 %s220_s11, 4  ;;  %s17_s10 = int_to_ptr.vmem [resolvable:$true] %s16_s10  ;;  %s26_s12 = int_to_ptr.vmem [resolvable:$true] %s25_s12 }
   0x4   :  { %s161_s13 = scalar_lea.vmem %s17_s10, 128  ;;  %p166_p1 = scmp.lt.s32.totalorder %s17_s10, %s17_s10 }
   0x5   :  { %p162_p0 = scmp.ne.s32.totalorder %s17_s10, %s161_s13  ;;  %p167_p2 = scmp.lt.s32.totalorder %s161_s13, %s161_s13 }
   0x7   :  { %p168_p3 = por %p167_p2, %p166_p1 }
   0x9   :  { %p169_p4 = pnand %p168_p3, %p162_p0 }
   0xb   :  { %172 = shalt.err (!%p169_p4)
}
   0xc   :  { %19 = dma.hbm_to_vmem [thread:$0]  %s253_s0, 128, %s17_s10, [#allocation3]  }
   0xd   :  { %s181_s16 = scalar_lea.vmem %s26_s12, 256  ;;  %p186_p6 = scmp.lt.s32.totalorder %s26_s12, %s26_s12 }
   0xe   :  { %p182_p5 = scmp.ne.s32.totalorder %s26_s12, %s181_s16  ;;  %p187_p7 = scmp.lt.s32.totalorder %s181_s16, %s181_s16 }
  0x10   :  { %p188_p8 = por %p187_p7, %p186_p6 }
  0x12   :  { %p189_p9 = pnand %p188_p8, %p182_p5 }
  0x14   :  { %192 = shalt.err (!%p189_p9)
}
  0x15   :  { %s221_s17 = smov 128   ;;  %s222_s18 = smov 8  }
  0x16   :  { %31 = dma.hbm_to_vmem [thread:$0]  %s254_s1, 256, %s26_s12, [#allocation6], %s221_s17, %s221_s17, %s222_s18  }
  0x17   :  { %213 = dma.done.wait [#allocation3], 128  }
  0x18   :  { %214 = vsyncadd [#allocation3], 4294967168 }
  0x19   :  { %215 = dma.done.wait [#allocation6], 256  }
  0x1a   :  { %216 = vsyncadd [#allocation6], 4294967040  ;;  %v223_v0 = vmov 1   ;;  %v224_v1 = vmov 0   ;;  %v39_v2 = vld [vmem:[#allocation5] sm:$0xff]  ;;  %v40_v3 = vld [vmem:[#allocation5 + $0x8] sm:$0xff]  ;;  %v51_v7 = vlaneseq }
  0x1b   :  { %142 = vset.pattern.permute.xlu1 %v223_v0  ;;  %141 = vset.pattern.permute.xlu0 %v224_v1  ;;  %v225_v4 = vmov 2   ;;  %v226_v5 = vmov 3   ;;  %v227_v6 = vmov 4   ;;  %v38_v11 = vld [vmem:[#allocation2] sm:$0xff]  ;;  %s228_s0 = smov [#allocation7]  }
  0x1c   :  { %58 = vperm.xlu1 %142, %v39_v2   ;;  %43 = vperm.xlu0 %141, %v39_v2   ;;  %v52_v8 = vshrl.u32 %v51_v7, 7  ;;  %s120_s1 = sshll.u32 %s228_s0, 4  ;;  %s121_s1 = int_to_ptr.vmem [resolvable:$true] %s120_s1 }
  0x1d   :  { %s193_s21 = scalar_lea.vmem %s121_s1, 16  ;;  %s197_s22 = scalar_lea.vmem %s121_s1, 32 }
  0x1e   :  { %v67_v9 = vsub.s32 1, %v52_v8  ;;  %v53_v10 = vsub.s32 0, %v52_v8  ;;  %p194_p10 = scmp.ne.s32.totalorder %s121_s1, %s193_s21  ;;  %p198_p11 = scmp.lt.s32.totalorder %s121_s1, %s121_s1 }
  0x1f   :  { %p199_p12 = scmp.lt.s32.totalorder %s197_s22, %s193_s21 }
  0x20   :  { %62 = vperm.xlu1 %142, %v40_v3   ;;  %48 = vperm.xlu0 %141, %v40_v3   ;;  %v68_v13 = vrot.slane %v38_v11, %v67_v9  ;;  %v54_v15 = vrot.slane %v38_v11, %v53_v10 }
  0x21   :  { %p200_p13 = por %p199_p12, %p198_p11 }
  0x23   :  { %p201_p0 = pnand %p200_p13, %p194_p10 }
  0x24   :  { %144 = vset.pattern.permute.xlu1 %v225_v4  ;;  %143 = vset.pattern.permute.xlu0 %v225_v4 }
  0x25   :  { %78 = vperm.xlu1 %144, %v40_v3   ;;  %74 = vperm.xlu0 %143, %v39_v2  }
  0x29   :  { %145 = vset.pattern.permute.xlu1 %v226_v5  ;;  %146 = vset.pattern.permute.xlu0 %v226_v5 }
  0x2a   :  { %86 = vperm.xlu1 %145, %v39_v2   ;;  %90 = vperm.xlu0 %146, %v40_v3  }
  0x2e   :  { %147 = vset.pattern.permute.xlu1 %v227_v6  ;;  %148 = vset.pattern.permute.xlu0 %v227_v6 }
  0x2f   :  { %103 = vperm.xlu1 %147, %v39_v2  }
  0x97   :  { %v59_v12 = vpop.permute.xlu1 %58  ;;  %v44_v14 = vpop.permute.xlu0 %43 }
  0x98   :  { %v69_v16 = vmul.f32 %v68_v13, %v59_v12  ;;  %v55_v17 = vmul.f32 %v54_v15, %v44_v14 }
  0x9a   :  { %v71_v23 = vadd.f32 %v69_v16, %v55_v17 }
  0x9b   :  { %v63_v18 = vpop.permute.xlu1 %62  ;;  %v49_v19 = vpop.permute.xlu0 %48 }
  0x9c   :  { %v70_v20 = vmul.f32 %v68_v13, %v63_v18  ;;  %v56_v21 = vmul.f32 %v54_v15, %v49_v19 }
  0x9e   :  { %v72_v22 = vadd.f32 %v70_v20, %v56_v21 }
  0xa0   :  { %v79_v24 = vpop.permute.xlu1 %78  ;;  %v75_v25 = vpop.permute.xlu0 %74 }
  0xa1   :  { %v82_v26 = vadd.f32 %v79_v24, %v72_v22  ;;  %v81_v27 = vadd.f32 %v75_v25, %v71_v23 }
  0xa3   :  { %v84_v28 = vmax.f32 %v82_v26, 0.0  ;;  %v83_v29 = vmax.f32 %v81_v27, 0.0 }
  0xa5   :  { %v87_v30 = vpop.permute.xlu1 %86  ;;  %v91_v31 = vpop.permute.xlu0 %90 }
  0xa6   :  { %v93_v32 = vmul.f32 %v87_v30, %v83_v29  ;;  %v94_v33 = vmul.f32 %v91_v31, %v84_v28 }
  0xa8   :  { %v95_v34 = vadd.f32 %v94_v33, %v93_v32 }
  0xaa   :  { %v96_v35 = vrot.slane %v95_v34, 4  ;;  %v104_v40 = vpop.permute.xlu1 %103 }
  0xac   :  { %v97_v36 = vadd.f32 %v96_v35, %v95_v34 }
  0xae   :  { %v98_v37 = vrot.slane %v97_v36, 2 }
  0xb0   :  { %v99_v38 = vadd.f32 %v98_v37, %v97_v36 }
  0xb2   :  { %v100_v39 = vrot.slane %v99_v38, 1 }
  0xb4   :  { %v101_v41 = vadd.f32 %v100_v39, %v99_v38 }
  0xb6   :  { %v106_v42 = vadd.f32 %v104_v40, %v101_v41 }
  0xb8   :  { %v130_v43 = vmul.f32 -1.442695, %v106_v42 }
  0xba   :  { %149 = vpow2.f32 %v130_v43 }
  0xc7   :  { %v150_v44 = vpop.eup %149 }
  0xc8   :  { %v110_v45 = vadd.f32 1.0, %v150_v44 }
  0xca   :  { %151 = vrcp.f32 %v110_v45 }
  0xd7   :  { %v152_v46 = vpop.eup %151 }
  0xd8   :  { %113 = vst [vmem:[#allocation7] sm:$0x1] %v152_v46 }
  0xd9   :  { %204 = shalt.err (!%p201_p0)
}
  0xda   :  { %123 = dma.vmem_to_hbm [thread:$0]  %s121_s1, 16, %s255_s2, [#allocation4]  }
  0xdb   :  { %217 = dma.done.wait [#allocation4], 16  }
  0xdc   :  { %218 = vsyncadd [#allocation4], 4294967280 }
  0xdd   :  { %127 = vsyncpa [#allocation3], 1 }
  0xde   :  { %128 = vsyncpa [#allocation6], 1 }
  0xdf   :  { %129 = vsyncpa [#allocation4], 1 }

</bundles_post_ra>
